<compile_context>
chip_gen: v7x
topology: tpu7x:2x2x1
jax: 0.10.0
libtpu: 0.0.40
codegen_flags: <defaults>
</compile_context>

<pallas_src>
import jax
import jax.numpy as jnp
from jax import lax
from jax.experimental import pallas as pl
from jax.experimental.pallas import tpu as pltpu


def self_attn_kernel(x_ref, q_ref, k_ref, v_ref, out_ref, m_sc, acc_sc):
    ki = pl.program_id(2)

    @pl.when(ki == 0)
    def _init():
        m_sc[...] = jnp.full_like(m_sc, -jnp.inf)
        acc_sc[...] = jnp.zeros_like(acc_sc)

    q = q_ref[0]            # (Ck,  tq) compute dtype (resident across ki)
    k = k_ref[0]            # (Ck,  tk)
    v = v_ref[0]            # (C+1, tk) last row == 1 (softmax-denominator row)
    cdt = q.dtype

    # Transposed energy tile: sT[m, n] = k[:, m] . q[:, n]  -> (tk, tq), f32 acc.
    # Contraction is over the low-rank Ck = C//8 channel axis.
    sT = lax.dot_general(k, q, (((0,), (0,)), ((), ())),
                         preferred_element_type=jnp.float32)

    # Online softmax over the key axis (sublane axis of sT); state is (1, tq).
    m_prev = m_sc[...]
    m_new = jnp.maximum(m_prev, jnp.max(sT, axis=0, keepdims=True))   # (1, tq)
    alpha = jnp.exp(m_prev - m_new)                                   # (1, tq)
    p = jnp.exp(sT - m_new)                                           # (tk, tq)
    # PV matmul also accumulates the denominator via the appended ones-row of v.
    acc_sc[...] = alpha * acc_sc[...] + jnp.dot(
        v, p.astype(cdt), preferred_element_type=jnp.float32)         # (C+1, tq)
    m_sc[...] = m_new

    @pl.when(ki == pl.num_programs(2) - 1)
    def _finalize():
        acc = acc_sc[...]
        num = acc[:-1, :]                      # (C, tq): gamma * v @ softmax-numerator
        l = acc[-1:, :]                        # (1, tq): softmax denominator
        inv_l = pl.reciprocal(l, approx=True)
        inv_l = inv_l * (2.0 - l * inv_l)      # one Newton step -> ~f32 accuracy
        y = num * inv_l + x_ref[0].astype(jnp.float32)
        out_ref[0] = y.astype(out_ref.dtype)   # lane-dense (C, tq) store


def _tpu_vmem_capacity_bytes():
    try:
        return int(pltpu.get_tpu_info().vmem_capacity_bytes)
    except Exception:
        return 64 * 1024 * 1024   # conservative (v7x per-core) fallback


def _tile_candidates(n, cap):
    """Multiples of 128 dividing n (largest first), capped; fallback = full n."""
    if n <= 128:
        return [n]
    cand = [t for t in range(128, min(cap, n) + 1, 128) if n % t == 0]
    return sorted(cand, reverse=True) if cand else [n]


def _live_vmem_bytes(C, Ck, tq, tk):
    # Double-buffered in/out tiles (worst case 4 B/elem) + f32 softmax scratch.
    tiles = 2 * (C * tq + Ck * tq + Ck * tk + (C + 1) * tk + C * tq)
    scratch = (C + 2) * tq
    return 4 * (tiles + scratch)


def _pick_tiles(N, C, Ck, vmem_cap):
    """Chip-aware tile choice: largest key tile first (amortizes per-step
    accumulator rescale + step overhead), then largest query tile that fits."""
    budget = max(int(0.4 * vmem_cap), 8 * 1024 * 1024)
    for tk in _tile_candidates(N, 2048):
        for tq in _tile_candidates(N, 1024):
            if _live_vmem_bytes(C, Ck, tq, tk) <= budget:
                return tq, tk
    t = _tile_candidates(N, 128)[-1]
    return t, t


def self_attn_pallas(x_nchw, wq, bq, wk, bk, wv, bv, gamma,
                     *, tq=None, tk=None, compute_dtype=None):
    B, C, W, H = x_nchw.shape
    N = W * H
    Ck = wq.shape[0]                        # C // 8
    cdt = jnp.dtype(compute_dtype) if compute_dtype is not None else x_nchw.dtype

    x = x_nchw.reshape(B, C, N)             # lane-dense (B, C, N); no transpose

    # Hoisted 1x1 convs: channel matmuls over the whole input, done once in f32
    # and cast to the compute dtype only at the kernel boundary.  gamma is
    # folded into the value projection (gamma*(Wv x + bv)).
    xf = x.astype(jnp.float32)
    f32 = lambda a: a.astype(jnp.float32)
    q = jnp.einsum('oc,bcn->bon', f32(wq), xf) + f32(bq)[None, :, None]       # (B, Ck, N)
    k = jnp.einsum('oc,bcn->bon', f32(wk), xf) + f32(bk)[None, :, None]       # (B, Ck, N)
    g = jnp.asarray(gamma, jnp.float32).reshape(())
    v = jnp.einsum('oc,bcn->bon', g * f32(wv), xf) + (g * f32(bv))[None, :, None]  # (B, C, N)
    # Ones row -> PV matmul also produces the softmax denominator (MXU, not XLU).
    v_aug = jnp.concatenate([v, jnp.ones((B, 1, N), jnp.float32)], axis=1)    # (B, C+1, N)

    q_c, k_c, v_c = q.astype(cdt), k.astype(cdt), v_aug.astype(cdt)

    vmem_cap = _tpu_vmem_capacity_bytes()
    if tq is None or tk is None:
        atq, atk = _pick_tiles(N, C, Ck, vmem_cap)
        tq = atq if tq is None else tq
        tk = atk if tk is None else tk
    assert N % tq == 0 and N % tk == 0, (N, tq, tk)
    # NOTE: on v7x (2 TensorCores/chip) keep B * (N // tq) >= 2 (ideally even)
    # so both cores get query-tile work.
    grid = (B, N // tq, N // tk)

    vmem_limit = int(min(0.75 * vmem_cap,
                         max(32 * 1024 * 1024, 3 * _live_vmem_bytes(C, Ck, tq, tk))))

    out = pl.pallas_call(
        self_attn_kernel,
        out_shape=jax.ShapeDtypeStruct((B, C, N), x_nchw.dtype),
        grid_spec=pltpu.PrefetchScalarGridSpec(
            num_scalar_prefetch=0,
            grid=grid,
            in_specs=[
                pl.BlockSpec((1, C, tq),     lambda b, qi, ki: (b, 0, qi)),   # x (residual)
                pl.BlockSpec((1, Ck, tq),    lambda b, qi, ki: (b, 0, qi)),   # q tile
                pl.BlockSpec((1, Ck, tk),    lambda b, qi, ki: (b, 0, ki)),   # k tile
                pl.BlockSpec((1, C + 1, tk), lambda b, qi, ki: (b, 0, ki)),   # v (+ones) tile
            ],
            out_specs=pl.BlockSpec((1, C, tq), lambda b, qi, ki: (b, 0, qi)),
            scratch_shapes=[
                pltpu.VMEM((1, tq), jnp.float32),        # running max
                pltpu.VMEM((C + 1, tq), jnp.float32),    # [attn-out accumulator; denom]
            ],
        ),
        compiler_params=pltpu.CompilerParams(
            dimension_semantics=("parallel", "parallel", "arbitrary"),
            vmem_limit_bytes=vmem_limit),
    )(x, q_c, k_c, v_c)

    return out.reshape(B, C, W, H)


def self_attn_ref(x, wq, bq, wk, bk, wv, bv, gamma):
    """Pure-JAX reference mirroring the PyTorch forward exactly (un-folded)."""
    B, C, W, H = x.shape
    N = W * H
    xf = x.reshape(B, C, N).astype(jnp.float32)
    q = jnp.einsum('oc,bcn->bon', wq, xf) + bq[None, :, None]    # (B, Ck, N)
    k = jnp.einsum('oc,bcn->bon', wk, xf) + bk[None, :, None]    # (B, Ck, N)
    v = jnp.einsum('oc,bcn->bon', wv, xf) + bv[None, :, None]    # (B, C,  N)
    energy = jnp.einsum('bon,bom->bnm', q, k)                    # (B, N, N)
    attn = jax.nn.softmax(energy, axis=-1)
    out = jnp.einsum('bcm,bnm->bcn', v, attn).reshape(B, C, W, H)
    return jnp.asarray(gamma, jnp.float32).reshape(()) * out + x.astype(jnp.float32)


if __name__ == "__main__":
    # Small shapes consistent with the module (in_dim must be >= 8).
    B, C, W, H = 2, 32, 16, 16
    Ck = C // 8

    key = jax.random.PRNGKey(0)
    kx, kq, kk_, kv, kbq, kbk, kbv = jax.random.split(key, 7)

    x = jax.random.normal(kx, (B, C, W, H), dtype=jnp.float32)

    # 1x1 Conv2d weights collapsed to (out, in).
    wq = 0.1 * jax.random.normal(kq, (Ck, C), dtype=jnp.float32)
    wk = 0.1 * jax.random.normal(kk_, (Ck, C), dtype=jnp.float32)
    wv = 0.1 * jax.random.normal(kv, (C, C), dtype=jnp.float32)
    bq = 0.05 * jax.random.normal(kbq, (Ck,), dtype=jnp.float32)
    bk = 0.05 * jax.random.normal(kbk, (Ck,), dtype=jnp.float32)
    bv = 0.05 * jax.random.normal(kbv, (C,), dtype=jnp.float32)
    # PyTorch inits gamma to 0 (output == input); use a nonzero value so the
    # attention path is actually exercised / verified.
    gamma = jnp.array([0.5], dtype=jnp.float32)

    ref = self_attn_ref(x, wq, bq, wk, bk, wv, bv, gamma)

    # f32 path with tq = tk = 128 -> grid (2, 2, 2): exercises the multi-step
    # online-softmax reduction and the pl.when init/finalize.
    out = self_attn_pallas(x, wq, bq, wk, bk, wv, bv, gamma, tq=128, tk=128)
    out = jax.block_until_ready(out)
    assert out.shape == (B, C, W, H)
    err = float(jnp.max(jnp.abs(out - ref)))
    assert err < 5e-3, f"f32 mismatch vs reference, max_err={err}"

    # bf16 compute path (what v6e/v7x should run for full MXU rate); softmax
    # state, accumulator and the residual add stay f32.  Auto-picked tiles
    # (tq = tk = 256) exercise the single-reduction-step path too.
    out_bf16 = self_attn_pallas(x, wq, bq, wk, bk, wv, bv, gamma,
                                compute_dtype=jnp.bfloat16)
    out_bf16 = jax.block_until_ready(out_bf16)
    err_bf16 = float(jnp.max(jnp.abs(out_bf16.astype(jnp.float32) - ref)))
    assert err_bf16 < 1e-1, f"bf16 mismatch vs reference, max_err={err_bf16}"

    print("KERNEL_OK")
</pallas_src>

<mosaic_0001>
module attributes {stable_mosaic.version = 11 : i64} {
  func.func @self_attn_kernel(%arg0: i32, %arg1: i32, %arg2: i32, %arg3: memref<1x32x128xf32, #tpu.memory_space<vmem>>, %arg4: memref<1x4x128xf32, #tpu.memory_space<vmem>>, %arg5: memref<1x4x128xf32, #tpu.memory_space<vmem>>, %arg6: memref<1x33x128xf32, #tpu.memory_space<vmem>>, %arg7: memref<1x32x128xf32, #tpu.memory_space<vmem>>, %arg8: memref<1x128xf32, #tpu.memory_space<vmem>>, %arg9: memref<33x128xf32, #tpu.memory_space<vmem>>) attributes {dimension_semantics = [#tpu.dimension_semantics<parallel>, #tpu.dimension_semantics<parallel>, #tpu.dimension_semantics<arbitrary>], iteration_bounds = array<i64: 2, 2, 2>, scalar_prefetch = 0 : i64, scratch_operands = 2 : i64, tpu.core_type = #tpu.core_type<tc>, window_params = [{transform_indices = @transform_0, window_bounds = array<i64: 1, 32, 128>}, {transform_indices = @transform_1, window_bounds = array<i64: 1, 4, 128>}, {transform_indices = @transform_2, window_bounds = array<i64: 1, 4, 128>}, {transform_indices = @transform_3, window_bounds = array<i64: 1, 33, 128>}, {transform_indices = @transform_4, window_bounds = array<i64: 1, 32, 128>}]} {
    %c0_i32 = arith.constant 0 : i32
    %0 = arith.cmpi eq, %arg2, %c0_i32 : i32
    %1 = arith.extui %0 : i1 to i32
    %c0_i32_0 = arith.constant 0 : i32
    %2 = arith.cmpi ne, %1, %c0_i32_0 : i32
    scf.if %2 {
      %cst_20 = arith.constant 0xFF800000 : f32
      %29 = vector.broadcast %cst_20 : f32 to vector<1x128xf32>
      %c0_21 = arith.constant 0 : index
      %c0_22 = arith.constant 0 : index
      %30 = vector.load %arg8[%c0_21, %c0_22] : memref<1x128xf32, #tpu.memory_space<vmem>>, vector<1x128xf32>
      tpu.vector_store %arg8[%c0_21, %c0_22], %29 {strides = array<i32>} : memref<1x128xf32, #tpu.memory_space<vmem>>, vector<1x128xf32>,
      %cst_23 = arith.constant 0.000000e+00 : f32
      %31 = vector.broadcast %cst_23 : f32 to vector<33x128xf32>
      %c0_24 = arith.constant 0 : index
      %c0_25 = arith.constant 0 : index
      %32 = vector.load %arg9[%c0_24, %c0_25] : memref<33x128xf32, #tpu.memory_space<vmem>>, vector<33x128xf32>
      tpu.vector_store %arg9[%c0_24, %c0_25], %31 {strides = array<i32>} : memref<33x128xf32, #tpu.memory_space<vmem>>, vector<33x128xf32>,
    } else {
    }
    %c0 = arith.constant 0 : index
    %c0_1 = arith.constant 0 : index
    %c0_2 = arith.constant 0 : index
    %3 = vector.load %arg4[%c0, %c0_1, %c0_2] : memref<1x4x128xf32, #tpu.memory_space<vmem>>, vector<1x4x128xf32>
    %4 = vector.shape_cast %3 : vector<1x4x128xf32> to vector<4x128xf32>
    %c0_3 = arith.constant 0 : index
    %c0_4 = arith.constant 0 : index
    %c0_5 = arith.constant 0 : index
    %5 = vector.load %arg5[%c0_3, %c0_4, %c0_5] : memref<1x4x128xf32, #tpu.memory_space<vmem>>, vector<1x4x128xf32>
    %6 = vector.shape_cast %5 : vector<1x4x128xf32> to vector<4x128xf32>
    %c0_6 = arith.constant 0 : index
    %c0_7 = arith.constant 0 : index
    %c0_8 = arith.constant 0 : index
    %7 = vector.load %arg6[%c0_6, %c0_7, %c0_8] : memref<1x33x128xf32, #tpu.memory_space<vmem>>, vector<1x33x128xf32>
    %8 = vector.shape_cast %7 : vector<1x33x128xf32> to vector<33x128xf32>
    %cst = arith.constant dense<0.000000e+00> : vector<128x128xf32>
    %9 = tpu.matmul %6, %4, %cst {dimension_numbers = #tpu.dot_dimension_numbers<[0], [0], [1], [1], [0, 1, 1, 1], [], []>} : vector<4x128xf32>, vector<4x128xf32>, vector<128x128xf32> -> vector<128x128xf32>
    %c0_9 = arith.constant 0 : index
    %c0_10 = arith.constant 0 : index
    %10 = vector.load %arg8[%c0_9, %c0_10] : memref<1x128xf32, #tpu.memory_space<vmem>>, vector<1x128xf32>
    %cst_11 = arith.constant dense<0xFF800000> : vector<128xf32>
    %11 = vector.multi_reduction <maximumf>, %9, %cst_11 [0] : vector<128x128xf32> to vector<128xf32>
    %12 = vector.shape_cast %11 : vector<128xf32> to vector<1x128xf32>
    %13 = arith.maximumf %10, %12 : vector<1x128xf32>
    %14 = arith.subf %10, %13 : vector<1x128xf32>
    %15 = math.exp %14 : vector<1x128xf32>
    %16 = vector.broadcast %13 : vector<1x128xf32> to vector<128x128xf32>
    %17 = arith.subf %9, %16 : vector<128x128xf32>
    %18 = math.exp %17 : vector<128x128xf32>
    %c0_12 = arith.constant 0 : index
    %c0_13 = arith.constant 0 : index
    %19 = vector.load %arg9[%c0_12, %c0_13] : memref<33x128xf32, #tpu.memory_space<vmem>>, vector<33x128xf32>
    %20 = vector.broadcast %15 : vector<1x128xf32> to vector<33x128xf32>
    %21 = arith.mulf %20, %19 : vector<33x128xf32>
    %cst_14 = arith.constant dense<0.000000e+00> : vector<33x128xf32>
    %22 = tpu.matmul %8, %18, %cst_14 {dimension_numbers = #tpu.dot_dimension_numbers<[1], [0], [0], [1], [0, 0, 1, 1], [], []>} : vector<33x128xf32>, vector<128x128xf32>, vector<33x128xf32> -> vector<33x128xf32>
    %23 = arith.addf %21, %22 : vector<33x128xf32>
    %c0_15 = arith.constant 0 : index
    %c0_16 = arith.constant 0 : index
    %24 = vector.load %arg9[%c0_15, %c0_16] : memref<33x128xf32, #tpu.memory_space<vmem>>, vector<33x128xf32>
    tpu.vector_store %arg9[%c0_15, %c0_16], %23 {strides = array<i32>} : memref<33x128xf32, #tpu.memory_space<vmem>>, vector<33x128xf32>,
    %c0_17 = arith.constant 0 : index
    %c0_18 = arith.constant 0 : index
    %25 = vector.load %arg8[%c0_17, %c0_18] : memref<1x128xf32, #tpu.memory_space<vmem>>, vector<1x128xf32>
    tpu.vector_store %arg8[%c0_17, %c0_18], %13 {strides = array<i32>} : memref<1x128xf32, #tpu.memory_space<vmem>>, vector<1x128xf32>,
    %c1_i32 = arith.constant 1 : i32
    %26 = arith.cmpi eq, %arg2, %c1_i32 : i32
    %27 = arith.extui %26 : i1 to i32
    %c0_i32_19 = arith.constant 0 : i32
    %28 = arith.cmpi ne, %27, %c0_i32_19 : i32
    scf.if %28 {
      %c0_20 = arith.constant 0 : index
      %c0_21 = arith.constant 0 : index
      %29 = vector.load %arg9[%c0_20, %c0_21] : memref<33x128xf32, #tpu.memory_space<vmem>>, vector<33x128xf32>
      %30 = vector.extract_strided_slice %29 {offsets = [0, 0], sizes = [32, 128], strides = [1, 1]} : vector<33x128xf32> to vector<32x128xf32>
      %31 = vector.extract_strided_slice %29 {offsets = [32, 0], sizes = [1, 128], strides = [1, 1]} : vector<33x128xf32> to vector<1x128xf32>
      %32 = tpu.reciprocal %31 {approx = true} : vector<1x128xf32> -> vector<1x128xf32>
      %33 = arith.mulf %31, %32 : vector<1x128xf32>
      %cst_22 = arith.constant 2.000000e+00 : f32
      %34 = vector.broadcast %cst_22 : f32 to vector<1x128xf32>
      %35 = arith.subf %34, %33 : vector<1x128xf32>
      %36 = arith.mulf %32, %35 : vector<1x128xf32>
      %37 = vector.broadcast %36 : vector<1x128xf32> to vector<32x128xf32>
      %38 = arith.mulf %30, %37 : vector<32x128xf32>
      %c0_23 = arith.constant 0 : index
      %c0_24 = arith.constant 0 : index
      %c0_25 = arith.constant 0 : index
      %39 = vector.load %arg3[%c0_23, %c0_24, %c0_25] : memref<1x32x128xf32, #tpu.memory_space<vmem>>, vector<1x32x128xf32>
      %40 = vector.shape_cast %39 : vector<1x32x128xf32> to vector<32x128xf32>
      %41 = arith.addf %38, %40 : vector<32x128xf32>
      %c0_26 = arith.constant 0 : index
      %c0_27 = arith.constant 0 : index
      %c0_28 = arith.constant 0 : index
      %42 = vector.load %arg7[%c0_26, %c0_27, %c0_28] : memref<1x32x128xf32, #tpu.memory_space<vmem>>, vector<1x32x128xf32>
      %43 = vector.shape_cast %42 : vector<1x32x128xf32> to vector<32x128xf32>
      %44 = vector.shape_cast %41 : vector<32x128xf32> to vector<1x32x128xf32>
      tpu.vector_store %arg7[%c0_26, %c0_27, %c0_28], %44 {strides = array<i32>} : memref<1x32x128xf32, #tpu.memory_space<vmem>>, vector<1x32x128xf32>,
    } else {
    }
    return
  }
  func.func @transform_0(%arg0: i32, %arg1: i32, %arg2: i32) -> (i32, i32, i32) {
    %c0_i32 = arith.constant 0 : i32
    %c0_i32_0 = arith.constant 0 : i32
    return %arg0, %c0_i32, %arg1 : i32, i32, i32
  }
  func.func @transform_1(%arg0: i32, %arg1: i32, %arg2: i32) -> (i32, i32, i32) {
    %c0_i32 = arith.constant 0 : i32
    %c0_i32_0 = arith.constant 0 : i32
    return %arg0, %c0_i32, %arg1 : i32, i32, i32
  }
  func.func @transform_2(%arg0: i32, %arg1: i32, %arg2: i32) -> (i32, i32, i32) {
    %c0_i32 = arith.constant 0 : i32
    %c0_i32_0 = arith.constant 0 : i32
    return %arg0, %c0_i32, %arg2 : i32, i32, i32
  }
  func.func @transform_3(%arg0: i32, %arg1: i32, %arg2: i32) -> (i32, i32, i32) {
    %c0_i32 = arith.constant 0 : i32
    %c0_i32_0 = arith.constant 0 : i32
    return %arg0, %c0_i32, %arg2 : i32, i32, i32
  }
  func.func @transform_4(%arg0: i32, %arg1: i32, %arg2: i32) -> (i32, i32, i32) {
    %c0_i32 = arith.constant 0 : i32
    %c0_i32_0 = arith.constant 0 : i32
    return %arg0, %c0_i32, %arg1 : i32, i32, i32
  }
}

</mosaic_0001>

<bundles_post_ra>
// kernel: tpu_custom_call.1
= control target key start
LH: loop header
LB: loop body
LE: loop exit
PB: predicated region body
PF: predicated region fallthrough
CT: control target
= control target key end

     0   :  { %s1880_s0 = inlined_call_operand.vmem [shape: f32[2,32,256], index: 0, kind: input, shape index: {}]   ;;  %s1881_s1 = inlined_call_operand.vmem [shape: f32[2,4,256], index: 1, kind: input, shape index: {}]   ;;  %s1882_s2 = inlined_call_operand.vmem [shape: f32[2,4,256], index: 2, kind: input, shape index: {}]   ;;  %s1883_s3 = inlined_call_operand.vmem [shape: f32[2,33,256], index: 3, kind: input, shape index: {}]   ;;  %s1884_s4 = inlined_call_operand.hbm [shape: f32[2,32,256], index: 4, kind: output, shape index: {}]  }
   0x1   :  { %1894 = sst [smem:[#allocation18_spill]] %s1880_s0 }
   0x2   :  { %1895 = sst [smem:[#allocation19_spill]] %s1883_s3 }
   0x3   :  { %9 = vsyncpa [#allocation7], 0 }
   0x4   :  { %11 = vsyncpa [#allocation7 + $0x1], 0  ;;  %s1542_s15 = smov 0   ;;  %s1544_s16 = smov 0  }
   0x5   :  { %s1546_s17 = smov 0   ;;  %s1548_s18 = smov 0  }
   0x6   :  { %s1550_s19 = smov 0   ;;  %s1552_s20 = smov 0  }
   0x7   :  { %s1554_s21 = smov 0   ;;  %s1556_s22 = smov 0  }
   0x8   :  { %s1558_s23 = smov 0   ;;  %s1560_s24 = smov 0  }
   0x9   :  { %s1562_s25 = smov 0   ;;  %s1564_s26 = smov 0  }
   0xa LB: > { %1896 = sst [smem:[#allocation9_spill]] %s1462_s15  ;;  %s1040_s27 = sadd.s32 4294967295, %s1506_s26   ;;  %s1506_s26 = sphi %s1564_s26, %s17_s26   ;;  %s1502_s25 = sphi %s1562_s25, %s1920_s25   ;;  %s1498_s24 = sphi %s1560_s24, %s1919_s24   ;;  %s1494_s23 = sphi %s1558_s23, %s1918_s23   ;;  %s1490_s22 = sphi %s1556_s22, %s1917_s22   ;;  %s1486_s21 = sphi %s1554_s21, %s1916_s21   ;;  %s1482_s20 = sphi %s1552_s20, %s1915_s20   ;;  %s1478_s19 = sphi %s1550_s19, %s1925_s19   ;;  %s1474_s18 = sphi %s1548_s18, %s1924_s18   ;;  %s1470_s17 = sphi %s1546_s17, %s1923_s17   ;;  %s1466_s16 = sphi %s1544_s16, %s1922_s16   ;;  %s1462_s15 = sphi %s1542_s15, %s1921_s15  }
   0xb   : > { %1897 = sst [smem:[#allocation10_spill]] %s1494_s23  ;;  %s1041_s28 = sadd.s32 4294967294, %s1506_s26  }
   0xc   : > { %1898 = sst [smem:[#allocation11_spill]] %s1498_s24  ;;  %s29_s29 = sadd.s32 1, %s1494_s23 }
   0xd   : > { %1899 = sst [smem:[#allocation12_spill]] %s1502_s25  ;;  %p30_p0 = scmp.ge.s32.totalorder %s29_s29, 2 }
   0xe   : > { %s32_s30 = sadd.s32 1, %s1498_s24  ;;  %s36_s5 = sadd.s32 1, %s1502_s25 }
   0xf   : > { %p52_p1 = scmp.ne.s32.totalorder %s1478_s19, %s1474_s18  ;;  %s1927_s29 = smov (%p30_p0, %s29_s29), 0 }
  0x10   : > { %1900 = sst [smem:[#allocation13_spill]] %s1927_s29  ;;  %s1929_s30 = smov (!%p30_p0, %s32_s30), %s1498_s24 }
  0x11   : > { %s45_s6 = sadd.s32 1, %s1478_s19  ;;  %p53_p2 = scmp.eq.s32.totalorder %s1506_s26, 0 }
  0x12   : > { %p34_p3 = scmp.ge.s32.totalorder %s1929_s30, 2  ;;  %s125_s7 = ssub.s32 %s1494_s23, %s1927_s29 }
  0x13   : > { %p1619_p4 = por %p53_p2, %p52_p1  ;;  %p136_p5 = scmp.ne.s32.totalorder %s1470_s17, %s1466_s16 }
  0x14   : > { %s1931_s30 = smov (%p34_p3, %s1929_s30), 0  ;;  %s1933_s5 = smov (!%p34_p3, %s36_s5), %s1502_s25 }
  0x15   : > { %1902 = sst [smem:[#allocation14_spill]] %s1931_s30  ;;  %s41_s9 = ssub.s32 %s1498_s24, %s1931_s30 }
  0x16   : > { %p1630_p6 = por %p136_p5, %p53_p2  ;;  %p38_p7 = scmp.ge.s32.totalorder %s1933_s5, 2 }
  0x17   : > { %p168_p8 = scmp.eq.s32.totalorder %s1040_s27, 7  ;;  %p173_p9 = scmp.ne.s32.totalorder %s1474_s18, %s1462_s15 }
  0x18   : > { %p174_p10 = scmp.eq.s32.totalorder %s1041_s28, 7  ;;  %s1935_s5 = smov (%p38_p7, %s1933_s5), 0 }
  0x19   : > { %1904 = sst [smem:[#allocation15_spill]] %s1935_s5  ;;  %p1641_p11 = por %p168_p8, %p52_p1 }
  0x1a   : > { %p1645_p12 = por %p174_p10, %p173_p9  ;;  %s40_s13 = ssub.s32 %s1502_s25, %s1935_s5 }
  0x1b   : > { %s129_s14 = sadd.s32 1, %s1470_s17  ;;  %s42_s30 = sor.u32 %s41_s9, %s40_s13 }
  0x1c   : > { %s1906_s12 = scalar_select %p1645_p12, 1, 0 }
  0x1d   : > { %s126_s29 = sor.u32 %s125_s7, %s40_s13  ;;  %p43_p13 = scmp.eq.s32.totalorder %s42_s30, 0 }
  0x1e   : > { %1907 = sst [smem:[#allocation16_spill]] %s1906_s12  ;;  %p127_p0 = scmp.eq.s32.totalorder %s126_s29, 0 }
  0x1f   : > { %s1653_s27 = scalar_select %p43_p13, %s1478_s19, %s45_s6  }
  0x20   : > { %s1656_s28 = scalar_select %p127_p0, %s1470_s17, %s129_s14  }
  0x21   : > { %1908 = sst [smem:[#allocation17_spill]] %s1653_s27  ;;  %p1043_p2 = scmp.ge.s32.totalorder %s1506_s26, 8 }
  0x23   : > { %190 = sbr.rel (%p1043_p2) target bundleno = 66 (0x42), region = 16 }
  0x2a   : > { %193 = sbr.rel (!%p1619_p4) target bundleno = 54 (0x36), region = 20  ;;  %s195_s12 = sand.u32 (%p1619_p4), 1, %s1478_s19  }
  0x2b   : > { %s1045_s5 = sshll.u32 (%p1619_p4), %s1502_s25, 3  ;;  %s1044_s15 = sshll.u32 (%p1619_p4), %s195_s12, 5 }
  0x2c   : > { %s199_s9 = sadd.s32 (%p1619_p4), %s1498_s24, %s1045_s5  ;;  %s1909_s0 = sld [smem:[#allocation18_spill]] (%p1619_p4) }
  0x2d   : > { %s1046_s7 = sshll.u32 (%p1619_p4), %s199_s9, 3  ;;  %s197_s13 = scalar_lea.vmem (%p1619_p4), [#allocation4], %s1044_s15 }
  0x32   : > { %s201_s6 = scalar_lea.vmem %s1909_s0, %s1046_s7 }
  0x33   : > { %v235_v0 = vld [vmem:[%s201_s6] sm:$0xff]  ;;  %v237_v1 = vld [vmem:[%s201_s6 + $0x10] sm:$0xff] }
  0x34   : > { %v239_v2 = vld [vmem:[%s201_s6 + $0x20] sm:$0xff]  ;;  %236 = vst [vmem:[%s197_s13] sm:$0xff] %v235_v0  ;;  %238 = vst [vmem:[%s197_s13 + $0x8] sm:$0xff] %v237_v1  ;;  %v241_v3 = vld [vmem:[%s201_s6 + $0x30] sm:$0xff] }
  0x35   : > { %240 = vst [vmem:[%s197_s13 + $0x10] sm:$0xff] %v239_v2  ;;  %242 = vst [vmem:[%s197_s13 + $0x18] sm:$0xff] %v241_v3 }
  0x36 PF: > { %270 = sbr.rel (!%p1630_p6) target bundleno = 66 (0x42), region = 66  ;;  %s272_s5 = sand.u32 (%p1630_p6), 1, %s1470_s17  }
  0x37   : > { %s1231_s8 = smul.u32 (%p1630_p6), 10, %s1502_s25  ;;  %s1910_s3 = sld [smem:[#allocation19_spill]] (%p1630_p6) }
  0x38   : > { %s1230_s12 = smul.u32 (%p1630_p6), 40, %s272_s5 }
  0x39   : > { %s276_s14 = sadd.s32 (%p1630_p6), %s1494_s23, %s1231_s8 }
  0x3a   : > { %s1047_s9 = sshll.u32 (%p1630_p6), %s276_s14, 3  ;;  %s274_s29 = scalar_lea.vmem (%p1630_p6), [#allocation5], %s1230_s12 }
  0x3d   : > { %s278_s15 = scalar_lea.vmem %s1910_s3, %s1047_s9 }
  0x3e   : > { %v314_v4 = vld [vmem:[%s278_s15] sm:$0xff]  ;;  %v316_v5 = vld [vmem:[%s278_s15 + $0x10] sm:$0xff] }
  0x3f   : > { %v318_v6 = vld [vmem:[%s278_s15 + $0x20] sm:$0xff]  ;;  %315 = vst [vmem:[%s274_s29] sm:$0xff] %v314_v4  ;;  %317 = vst [vmem:[%s274_s29 + $0x8] sm:$0xff] %v316_v5  ;;  %v320_v7 = vld [vmem:[%s278_s15 + $0x30] sm:$0xff] }
  0x40   : > { %319 = vst [vmem:[%s274_s29 + $0x10] sm:$0xff] %v318_v6  ;;  %v322_v8 = vld [vmem:[%s278_s15 + $0x40] sm:$0xff]  ;;  %321 = vst [vmem:[%s274_s29 + $0x18] sm:$0xff] %v320_v7 }
  0x41   : > { %323 = vst [vmem:[%s274_s29 + $0x20] sm:$0xff] %v322_v8 }
  0x42 PF: > { %p1048_p1 = scmp.ge.s32.totalorder %s1506_s26, 1  ;;  %p328_p3 = scmp.lt.s32.totalorder %s1506_s26, 9 }
  0x44   : > { %p329_p4 = pnand %p1048_p1, %p328_p3 }
  0x45   : > { %s1892_s10 = sand.u32 (!%p329_p4), 1, %s1474_s18   ;;  %s342_s6 = sand.u32 (!%p329_p4), 1, %s1466_s16  }
  0x46   : > { %332 = sbr.rel (%p329_p4) target bundleno = 846 (0x34e), region = 104  ;;  %s1049_s13 = sshll.u32 (!%p329_p4), %s1892_s10, 5 }
  0x47   : > { %s1232_s5 = smul.u32 (!%p329_p4), 40, %s342_s6  ;;  %p387_p5 = scmp.lt.s32.totalorder (!%p329_p4), %s1490_s22, 1 }
  0x48   : > { %p389_p6 = scmp.lt.s32.totalorder (!%p329_p4), %s1486_s21, 1  ;;  %p397_p7 = scmp.lt.s32.totalorder (!%p329_p4), %s1482_s20, 1 }
  0x49   : > { %s1693_s6 = scalar_lea.vmem (!%p329_p4), [#allocation4], %s1049_s13  ;;  %s1695_s23 = scalar_lea.vmem (!%p329_p4), [#allocation5], %s1232_s5 }
  0x4a   : > { %s1697_s27 = scalar_lea.vmem (!%p329_p4), [#allocation6], %s1049_s13  ;;  %p1055_p8 = scmp.ne.s32.totalorder (!%p329_p4), %s1482_s20, 0 }
  0x4d   : > { %s388_s8 = scalar_select %p387_p5, %s1490_s22, 1 }
  0x4e   : > { %s390_s12 = scalar_select %p389_p6, %s1486_s21, 1 }
  0x4f   : > { %s1051_s14 = sshll.u32 %s388_s8, 1  ;;  %v1508_v9 = vmov (!%p1055_p8), -inf   ;;  %v1509_v10 = vmov (!%p1055_p8), 0.0  }
  0x50   : > { %s392_s9 = sadd.s32 %s1051_s14, %s390_s12  ;;  %407 = vst [vmem:[#allocation2] sm:$0x1] (!%p1055_p8), %v1508_v9  ;;  %408 = vst [vmem:[#allocation3] sm:$0xff] (!%p1055_p8), %v1509_v10 }
  0x51   : > { %s1052_s7 = sshll.u32 %s392_s9, 2  ;;  %406 = sbr.rel (%p1055_p8) target bundleno = 88 (0x58), region = 116  ;;  %409 = vst [vmem:[#allocation3 + $0x8] sm:$0xff] (!%p1055_p8), %v1509_v10  ;;  %410 = vst [vmem:[#allocation3 + $0x10] sm:$0xff] (!%p1055_p8), %v1509_v10 }
  0x52   : > { %s394_s29 = scalar_lea.vmem %s1881_s1, %s1052_s7  ;;  %411 = vst [vmem:[#allocation3 + $0x18] sm:$0xff] (!%p1055_p8), %v1509_v10  ;;  %412 = vst [vmem:[#allocation3 + $0x20] sm:$0x1] (!%p1055_p8), %v1509_v10 }
  0x53   : > { %s398_s0 = scalar_select %p397_p7, %s1482_s20, 1 }
  0x55   : > { %s400_s3 = sadd.s32 %s1051_s14, %s398_s0 }
  0x56   : > { %s1054_s25 = sshll.u32 %s400_s3, 2 }
  0x57   : > { %s402_s10 = scalar_lea.vmem %s1882_s2, %s1054_s25 }
  0x58 PF: > { %v414_v11 = vld [vmem:[%s402_s10] sm:$0xf]  ;;  %vm501_vm0 = vcmask 1043456   ;;  %vm452_vm1 = vcmask 31744   ;;  %v1510_v29 = vmov 0.0|0.0   ;;  %vm1511_vm2 = vmmov 0  }
  0x59   : > { %420 = vxpose.xlu0.b32.start.end [1/1] (short) %v414_v11, 128  ;;  %v413_v12 = vld [vmem:[%s394_s29] sm:$0xf]  ;;  %1214 = vmatprep.subr.bf16.mxu1 %v1510_v29  ;;  %v1512_v31 = vmov 0.0   ;;  %v677_v0 = vlaneseq  ;;  %p1073_p9 = scmp.ne.s32.totalorder %s1482_s20, 1 }
  0x5a   : > { %1117 = vmatprep.subr.msk.mxu0 %vm501_vm0, %v413_v12  ;;  %1181 = vmatprep.mubr.msk.f32.mxu1 %vm1511_vm2, %v1512_v31  ;;  %v650_v5 = vld [vmem:[#allocation2] sm:$0x1] }
  0x5b   : > { %1118 = vmatpush3.msk.msra.mxu0 %vm501_vm0, %v413_v12  ;;  %v678_v3 = vshrl.u32 %v677_v0, 7 }
  0x5c   : > { %1190 = vmatprep.subr.bf16.mxu0 %v1510_v29 }
  0x5d   : > { %v1749_v7 = vsub.s32 0, %v678_v3 }
  0xd9   : > { %v436_v13 = vpop.trf.xlu0 }
  0xda   : > { %1119 = vmatprep.mubr.msk.f32.mxu0 %vm452_vm1, %v436_v13 }
  0xdd   : > { %v437_v14 = vpop.trf.xlu0 }
  0xde   : > { %1120 = vmatmul.mubr.msk.f32.vlgmr.msra.gmra.mrb[0].mxu0 %vm452_vm1, %v437_v14 }
  0xe1   : > { %v438_v15 = vpop.trf.xlu0 }
  0xe2   : > { %1122 = vmatprep.mubr.msk.f32.mxu0 %vm452_vm1, %v438_v15 }
  0xe5   : > { %v439_v16 = vpop.trf.xlu0 }
  0xe6   : > { %1123 = vmatmul.mubr.msk.f32.gmra.mrb[2].mxu0 %vm452_vm1, %v439_v16 }
  0xe9   : > { %v440_v17 = vpop.trf.xlu0 }
  0xea   : > { %1125 = vmatprep.mubr.msk.f32.mxu0 %vm452_vm1, %v440_v17 }
  0xed   : > { %v441_v18 = vpop.trf.xlu0 }
  0xee   : > { %1126 = vmatmul.mubr.msk.f32.gmra.mrb[4].mxu0 %vm452_vm1, %v441_v18 }
  0xf1   : > { %v442_v19 = vpop.trf.xlu0 }
  0xf2   : > { %1128 = vmatprep.mubr.msk.f32.mxu0 %vm452_vm1, %v442_v19 }
  0xf5   : > { %v443_v20 = vpop.trf.xlu0 }
  0xf6   : > { %1129 = vmatmul.mubr.msk.f32.gmra.mrb[6].mxu0 %vm452_vm1, %v443_v20 }
  0xf9   : > { %v444_v21 = vpop.trf.xlu0 }
  0xfa   : > { %1131 = vmatprep.mubr.msk.f32.mxu0 %vm452_vm1, %v444_v21 }
  0xfd   : > { %v445_v22 = vpop.trf.xlu0 }
  0xfe   : > { %1132 = vmatmul.mubr.msk.f32.gmra.mrb[8].mxu0 %vm452_vm1, %v445_v22 }
 0x101   : > { %v446_v23 = vpop.trf.xlu0 }
 0x102   : > { %1134 = vmatprep.mubr.msk.f32.mxu0 %vm452_vm1, %v446_v23 }
 0x105   : > { %v447_v24 = vpop.trf.xlu0 }
 0x106   : > { %1135 = vmatmul.mubr.msk.f32.gmra.mrb[10].mxu0 %vm452_vm1, %v447_v24 }
 0x109   : > { %v448_v25 = vpop.trf.xlu0 }
 0x10a   : > { %1137 = vmatprep.mubr.msk.f32.mxu0 %vm452_vm1, %v448_v25 }
 0x10d   : > { %v449_v26 = vpop.trf.xlu0 }
 0x10e   : > { %1138 = vmatmul.mubr.msk.f32.gmra.mrb[12].mxu0 %vm452_vm1, %v449_v26 }
 0x111   : > { %v450_v27 = vpop.trf.xlu0 }
 0x112   : > { %1140 = vmatprep.mubr.msk.f32.mxu0 %vm452_vm1, %v450_v27 }
 0x115   : > { %v451_v28 = vpop.trf.xlu0 }
 0x116   : > { %1141 = vmatmul.mubr.msk.f32.gmra.mrb[14].mxu0 %vm452_vm1, %v451_v28 }
 0x117   : > { %1175 = vmatprep.mubr.msk.f32.mxu0 %vm1511_vm2, %v1512_v31 }
 0x1b1   : > { %v1121_v30 = vpop.f32.mrb[0].mxu0 }
 0x1b2   : > { %v571_v32 = vpop.f32.mrb[1].mxu0 }
 0x1b9   : > { %v1124_v33 = vpop.f32.mrb[2].mxu0 }
 0x1ba   : > { %v581_v34 = vpop.f32.mrb[3].mxu0 }
 0x1c1   : > { %v1722_v35 = vpop.f32.mrb[4].mxu0 }
 0x1c2   : > { %v652_v36 = vmax.f32 %v1121_v30, %v1722_v35  ;;  %v591_v37 = vpop.f32.mrb[5].mxu0 }
 0x1c3   : > { %v651_v38 = vmax.f32 %v571_v32, %v591_v37 }
 0x1c9   : > { %v1725_v39 = vpop.f32.mrb[6].mxu0 }
 0x1ca   : > { %v654_v40 = vmax.f32 %v1124_v33, %v1725_v39  ;;  %v601_v41 = vpop.f32.mrb[7].mxu0 }
 0x1cb   : > { %v653_v42 = vmax.f32 %v581_v34, %v601_v41 }
 0x1d1   : > { %v1728_v43 = vpop.f32.mrb[8].mxu0 }
 0x1d2   : > { %v656_v44 = vmax.f32 %v652_v36, %v1728_v43  ;;  %v1731_v45 = vpop.f32.mrb[9].mxu0 }
 0x1d3   : > { %v655_v46 = vmax.f32 %v651_v38, %v1731_v45 }
 0x1d9   : > { %v1734_v47 = vpop.f32.mrb[10].mxu0 }
 0x1da   : > { %v658_v48 = vmax.f32 %v654_v40, %v1734_v47  ;;  %v1737_v49 = vpop.f32.mrb[11].mxu0 }
 0x1db   : > { %v657_v50 = vmax.f32 %v653_v42, %v1737_v49 }
 0x1e1   : > { %v1740_v51 = vpop.f32.mrb[12].mxu0 }
 0x1e2   : > { %v660_v52 = vmax.f32 %v656_v44, %v1740_v51  ;;  %v1743_v53 = vpop.f32.mrb[13].mxu0 }
 0x1e3   : > { %v659_v54 = vmax.f32 %v655_v46, %v1743_v53 }
 0x1e5   : > { %v663_v55 = vmax.f32 %v659_v54, %v660_v52 }
 0x1e9   : > { %v1746_v56 = vpop.f32.mrb[14].mxu0 }
 0x1ea   : > { %v662_v57 = vmax.f32 %v658_v48, %v1746_v56  ;;  %v641_v58 = vpop.f32.mrb[15].mxu0 }
 0x1eb   : > { %v661_v59 = vmax.f32 %v657_v50, %v641_v58 }
 0x1ed   : > { %v664_v60 = vmax.f32 %v661_v59, %v662_v57 }
 0x1ef   : > { %v665_v61 = vmax.f32 %v663_v55, %v664_v60 }
 0x1f1   : > { %v666_v62 = vrot.slane %v665_v61, 4 }
 0x1f3   : > { %v667_v63 = vmax.f32 %v665_v61, %v666_v62 }
 0x1f5   : > { %v668_v1 = vrot.slane %v667_v63, 2 }
 0x1f7   : > { %v669_v2 = vmax.f32 %v667_v63, %v668_v1 }
 0x1f9   : > { %v670_v4 = vrot.slane %v669_v2, 1 }
 0x1fb   : > { %v671_v6 = vmax.f32 %v669_v2, %v670_v4 }
 0x1fd   : > { %v672_v8 = vmax.f32 %v650_v5, %v671_v6 }
 0x1ff   : > { %v673_v9 = vsub.f32 %v650_v5, %v672_v8  ;;  %v680_v10 = vrot.slane %v672_v8, %v1749_v7  ;;  %846 = vst [vmem:[#allocation2] sm:$0x1] %v672_v8 }
 0x201   : > { %v674_v11 = vmul.f32 1.442695, %v673_v9  ;;  %v696_v12 = vsub.f32 %v641_v58, %v680_v10  ;;  %v682_v13 = vsub.f32 %v571_v32, %v680_v10  ;;  %v683_v14 = vsub.f32 %v1121_v30, %v680_v10  ;;  %v415_v9 = vld [vmem:[%s1695_s23] sm:$0xff] }
 0x202   : > { %v684_v15 = vsub.f32 %v581_v34, %v680_v10  ;;  %v685_v16 = vsub.f32 %v1124_v33, %v680_v10  ;;  %v686_v17 = vsub.f32 %v591_v37, %v680_v10  ;;  %v687_v18 = vsub.f32 %v1722_v35, %v680_v10 }
 0x203   : > { %1344 = vpow2.f32 %v674_v11  ;;  %v726_v19 = vmul.f32 1.442695, %v696_v12  ;;  %v698_v20 = vmul.f32 1.442695, %v682_v13  ;;  %v700_v21 = vmul.f32 1.442695, %v683_v14 }
 0x204   : > { %v702_v22 = vmul.f32 1.442695, %v684_v15  ;;  %v688_v23 = vsub.f32 %v601_v41, %v680_v10  ;;  %v704_v24 = vmul.f32 1.442695, %v685_v16  ;;  %v689_v25 = vsub.f32 %v1725_v39, %v680_v10  ;;  %v416_v11 = vld [vmem:[%s1695_s23 + $0x8] sm:$0xff]  ;;  %v418_v12 = vld [vmem:[%s1695_s23 + $0x18] sm:$0xff] }
 0x205   : > { %1346 = vpow2.f32 %v726_v19  ;;  %v690_v26 = vsub.f32 %v1731_v45, %v680_v10  ;;  %v706_v27 = vmul.f32 1.442695, %v686_v17  ;;  %v691_v28 = vsub.f32 %v1728_v43, %v680_v10  ;;  %v730_v13 = vld [vmem:[#allocation3] sm:$0xff]  ;;  %v732_v14 = vld [vmem:[#allocation3 + $0x10] sm:$0xff]  ;;  %v731_v19 = vld [vmem:[#allocation3 + $0x8] sm:$0xff] }
 0x206   : > { %1348 = vpow2.f32 %v698_v20  ;;  %v692_v30 = vsub.f32 %v1737_v49, %v680_v10  ;;  %v708_v32 = vmul.f32 1.442695, %v687_v18  ;;  %v693_v33 = vsub.f32 %v1734_v47, %v680_v10  ;;  %v733_v20 = vld [vmem:[#allocation3 + $0x18] sm:$0xff] }
 0x207   : > { %1350 = vpow2.f32 %v700_v21  ;;  %v710_v34 = vmul.f32 1.442695, %v688_v23  ;;  %v694_v35 = vsub.f32 %v1743_v53, %v680_v10  ;;  %v712_v36 = vmul.f32 1.442695, %v689_v25 }
 0x208   : > { %1352 = vpow2.f32 %v702_v22  ;;  %v695_v37 = vsub.f32 %v1740_v51, %v680_v10  ;;  %v697_v38 = vsub.f32 %v1746_v56, %v680_v10  ;;  %v714_v39 = vmul.f32 1.442695, %v690_v26  ;;  %v417_v10 = vld [vmem:[%s1695_s23 + $0x10] sm:$0xff] }
 0x209   : > { %1354 = vpow2.f32 %v704_v24  ;;  %v716_v40 = vmul.f32 1.442695, %v691_v28  ;;  %v718_v41 = vmul.f32 1.442695, %v692_v30  ;;  %v720_v43 = vmul.f32 1.442695, %v693_v33 }
 0x20a   : > { %1356 = vpow2.f32 %v706_v27  ;;  %v722_v44 = vmul.f32 1.442695, %v694_v35  ;;  %v724_v47 = vmul.f32 1.442695, %v695_v37  ;;  %v728_v49 = vmul.f32 1.442695, %v697_v38 }
 0x20b   : > { %1358 = vpow2.f32 %v708_v32  ;;  %v734_v28 = vld [vmem:[#allocation3 + $0x20] sm:$0x1] }
 0x20c   : > { %1360 = vpow2.f32 %v710_v34 }
 0x20d   : > { %v1345_v42 = vpop.eup %1344  ;;  %1362 = vpow2.f32 %v712_v36 }
 0x20e   : > { %1364 = vpow2.f32 %v714_v39  ;;  %v1762_v45 = vrot.slane %v1345_v42, %v1749_v7 }
 0x20f   : > { %v1347_v46 = vpop.eup %1346  ;;  %1366 = vpow2.f32 %v716_v40 }
 0x210   : > { %v1349_v48 = vpop.eup %1348  ;;  %1368 = vpow2.f32 %v718_v41  ;;  %v741_v15 = vmul.f32 %v1762_v45, %v730_v13  ;;  %v743_v16 = vmul.f32 %v1762_v45, %v732_v14  ;;  %v744_v25 = vmul.f32 %v1762_v45, %v733_v20 }
 0x211   : > { %v1351_v50 = vpop.eup %1350  ;;  %1370 = vpow2.f32 %v720_v43  ;;  %v745_v35 = vmul.f32 %v1762_v45, %v734_v28 }
 0x212   : > { %v1353_v51 = vpop.eup %1352  ;;  %v1191_v52 = vpack.c.bf16 %v1351_v50, %v1349_v48  ;;  %1372 = vpow2.f32 %v722_v44  ;;  %v869_v50 = vld [vmem:[%s1693_s6 + $0x8] sm:$0xff] (!%p1073_p9) }
 0x213   : > { %v1355_v53 = vpop.eup %1354  ;;  %1374 = vpow2.f32 %v724_v47 }
 0x214   : > { %v1357_v54 = vpop.eup %1356  ;;  %1192 = vmatpush3.bf16.msra.mxu0 %v1191_v52  ;;  %1222 = vmatpush3.bf16.msra.mxu1 %v1191_v52  ;;  %v1194_v55 = vpack.c.bf16 %v1355_v53, %v1353_v51  ;;  %1376 = vpow2.f32 %v728_v49  ;;  %v868_v49 = vld [vmem:[%s1693_s6] sm:$0xff] (!%p1073_p9)  ;;  %v870_v51 = vld [vmem:[%s1693_s6 + $0x10] sm:$0xff] (!%p1073_p9)  ;;  %v871_v52 = vld [vmem:[%s1693_s6 + $0x18] sm:$0xff] (!%p1073_p9) }
 0x215   : > { %v1359_v56 = vpop.eup %1358  ;;  %1193 = vmatprep.subr.bf16.mxu0 %v1510_v29  ;;  %1215 = vmatprep.subr.bf16.mxu1 %v1510_v29 }
 0x216   : > { %v1361_v57 = vpop.eup %1360  ;;  %v1197_v58 = vpack.c.bf16 %v1359_v56, %v1357_v54 }
 0x217   : > { %v1363_v59 = vpop.eup %1362 }
 0x218   : > { %v1365_v60 = vpop.eup %1364  ;;  %1195 = vmatpush3.bf16.msra.mxu0 %v1194_v55  ;;  %1223 = vmatpush3.bf16.msra.mxu1 %v1194_v55  ;;  %v1200_v61 = vpack.c.bf16 %v1363_v59, %v1361_v57 }
 0x219   : > { %v1367_v62 = vpop.eup %1366  ;;  %1196 = vmatprep.subr.bf16.mxu0 %v1510_v29  ;;  %1216 = vmatprep.subr.bf16.mxu1 %v1510_v29 }
 0x21a   : > { %v1369_v63 = vpop.eup %1368  ;;  %v1203_v0 = vpack.c.bf16 %v1367_v62, %v1365_v60 }
 0x21b   : > { %v1371_v1 = vpop.eup %1370 }
 0x21c   : > { %v1373_v2 = vpop.eup %1372  ;;  %1198 = vmatpush3.bf16.msra.mxu0 %v1197_v58  ;;  %1224 = vmatpush3.bf16.msra.mxu1 %v1197_v58  ;;  %v1206_v3 = vpack.c.bf16 %v1371_v1, %v1369_v63 }
 0x21d   : > { %v1375_v4 = vpop.eup %1374  ;;  %1199 = vmatprep.subr.bf16.mxu0 %v1510_v29  ;;  %1217 = vmatprep.subr.bf16.mxu1 %v1510_v29 }
 0x21e   : > { %v1377_v5 = vpop.eup %1376  ;;  %v1209_v6 = vpack.c.bf16 %v1375_v4, %v1373_v2 }
 0x21f   : > { %v1212_v8 = vpack.c.bf16 %v1377_v5, %v1347_v46 }
 0x220   : > { %1201 = vmatpush3.bf16.msra.mxu0 %v1200_v61  ;;  %1225 = vmatpush3.bf16.msra.mxu1 %v1200_v61 }
 0x221   : > { %1202 = vmatprep.subr.bf16.mxu0 %v1510_v29  ;;  %1218 = vmatprep.subr.bf16.mxu1 %v1510_v29 }
 0x224   : > { %1204 = vmatpush3.bf16.msra.mxu0 %v1203_v0  ;;  %1226 = vmatpush3.bf16.msra.mxu1 %v1203_v0 }
 0x225   : > { %1205 = vmatprep.subr.bf16.mxu0 %v1510_v29  ;;  %1219 = vmatprep.subr.bf16.mxu1 %v1510_v29 }
 0x228   : > { %1207 = vmatpush3.bf16.msra.mxu0 %v1206_v3  ;;  %1227 = vmatpush3.bf16.msra.mxu1 %v1206_v3 }
 0x229   : > { %1208 = vmatprep.subr.bf16.mxu0 %v1510_v29  ;;  %1220 = vmatprep.subr.bf16.mxu1 %v1510_v29 }
 0x22c   : > { %1210 = vmatpush3.bf16.msra.mxu0 %v1209_v6  ;;  %1228 = vmatpush3.bf16.msra.mxu1 %v1209_v6 }
 0x22d   : > { %1211 = vmatprep.subr.bf16.mxu0 %v1510_v29  ;;  %1221 = vmatprep.subr.bf16.mxu1 %v1510_v29  ;;  %v419_v29 = vld [vmem:[%s1695_s23 + $0x20] sm:$0x1] }
 0x230   : > { %1213 = vmatpush3.bf16.msra.mxu0 %v1212_v8  ;;  %1229 = vmatpush3.bf16.msra.mxu1 %v1212_v8 }
 0x233   : > { %1176 = vmatmul.mubr.f32.vlgmr.msra.gmra.mrb[16].mxu0 %v415_v9  ;;  %1182 = vmatmul.mubr.f32.vlgmr.msra.gmra.mrb[0].mxu1 %v417_v10 }
 0x234   : > { %1178 = vmatprep.mubr.msk.f32.mxu0 %vm1511_vm2, %v1512_v31  ;;  %1184 = vmatprep.mubr.msk.f32.mxu1 %vm1511_vm2, %v1512_v31 }
 0x237   : > { %1179 = vmatmul.mubr.f32.gmra.mrb[18].mxu0 %v416_v11  ;;  %1185 = vmatmul.mubr.f32.gmra.mrb[2].mxu1 %v418_v12 }
 0x238   : > { %1187 = vmatprep.mubr.msk.f32.mxu1 %vm1511_vm2, %v1512_v31  ;;  %v742_v31 = vmul.f32 %v1762_v45, %v731_v19 }
 0x23b   : > { %1188 = vmatmul.mubr.f32.gmra.mrb[4].mxu1 %v419_v29 }
 0x306   : > { %v812_v17 = vpop.f32.mrb[16].mxu0  ;;  %v822_v18 = vpop.f32.mrb[0].mxu1 }
 0x307   : > { %v836_v21 = vadd.f32 %v812_v17, %v741_v15  ;;  %v838_v22 = vadd.f32 %v822_v18, %v743_v16  ;;  %v1183_v23 = vpop.f32.mrb[1].mxu1  ;;  %v1177_v24 = vpop.f32.mrb[17].mxu0 }
 0x309   : > { %841 = vst [vmem:[#allocation3] sm:$0xff] %v836_v21  ;;  %843 = vst [vmem:[#allocation3 + $0x10] sm:$0xff] %v838_v22 }
 0x30a   : > { %v817_v26 = vpop.f32.mrb[18].mxu0  ;;  %v827_v27 = vpop.f32.mrb[2].mxu1 }
 0x30b   : > { %v837_v30 = vadd.f32 %v817_v26, %v742_v31  ;;  %v839_v32 = vadd.f32 %v827_v27, %v744_v25  ;;  %v1186_v33 = vpop.f32.mrb[3].mxu1  ;;  %v1180_v34 = vpop.f32.mrb[19].mxu0  ;;  %850 = sbr.rel (%p1073_p9) target bundleno = 818 (0x332), region = 120 }
 0x30d   : > { %842 = vst [vmem:[#allocation3 + $0x8] sm:$0xff] %v837_v30  ;;  %844 = vst [vmem:[#allocation3 + $0x18] sm:$0xff] %v839_v32 }
 0x30e   : > { %v832_v36 = vpop.f32.mrb[4].mxu1 }
 0x30f   : > { %v840_v37 = vadd.f32 %v832_v36, %v745_v35  ;;  %v1189_v38 = vpop.f32.mrb[5].mxu1 }
 0x310   : > { %v851_v43 = vld [vmem:[#allocation3] sm:$0xff] (!%p1073_p9)  ;;  %v853_v45 = vld [vmem:[#allocation3 + $0x10] sm:$0xff] (!%p1073_p9) }
 0x311   : > { %845 = vst [vmem:[#allocation3 + $0x20] sm:$0x1] %v840_v37 }
 0x314   : > { %v852_v46 = vld [vmem:[#allocation3 + $0x8] sm:$0xff]  ;;  %v854_v47 = vld [vmem:[#allocation3 + $0x18] sm:$0xff] }
 0x318   : > { %v855_v39 = vld [vmem:[#allocation3 + $0x20] sm:$0x1] }
 0x319   : > { %1378 = vrcp.f32 %v855_v39 }
 0x323   : > { %v1379_v40 = vpop.eup %1378 }
 0x324   : > { %v857_v41 = vmul.f32 %v1379_v40, %v855_v39 }
 0x326   : > { %v858_v42 = vsub.f32 2.0, %v857_v41 }
 0x328   : > { %v859_v44 = vmul.f32 %v1379_v40, %v858_v42 }
 0x32a   : > { %v863_v48 = vrot.slane %v859_v44, %v1749_v7 }
 0x32c   : > { %v864_v53 = vmul.f32 %v863_v48, %v851_v43  ;;  %v865_v54 = vmul.f32 %v863_v48, %v852_v46  ;;  %v866_v55 = vmul.f32 %v863_v48, %v853_v45  ;;  %v867_v56 = vmul.f32 %v863_v48, %v854_v47 }
 0x32e   : > { %v872_v57 = vadd.f32 %v868_v49, %v864_v53  ;;  %v873_v58 = vadd.f32 %v869_v50, %v865_v54  ;;  %v874_v59 = vadd.f32 %v870_v51, %v866_v55  ;;  %v875_v60 = vadd.f32 %v871_v52, %v867_v56 }
 0x330   : > { %876 = vst [vmem:[%s1697_s27] sm:$0xff] %v872_v57  ;;  %877 = vst [vmem:[%s1697_s27 + $0x8] sm:$0xff] %v873_v58 }
 0x331   : > { %878 = vst [vmem:[%s1697_s27 + $0x10] sm:$0xff] %v874_v59  ;;  %879 = vst [vmem:[%s1697_s27 + $0x18] sm:$0xff] %v875_v60 }
 0x332 PF: > { %s1075_s0 = sshll.u32 %s1490_s22, 3  ;;  %s895_s20 = sshll.u32 %s1697_s27, 4  ;;  %s1807_s20 = int_to_ptr.vmem [resolvable:$true] %s895_s20 }
 0x333   : > { %s892_s3 = sadd.s32 %s1486_s21, %s1075_s0  ;;  %s1911_s13 = sand.u32 1, %s1474_s18  }
 0x334   : > { %s1076_s23 = sshll.u32 %s892_s3, 7  ;;  %s1816_s5 = scalar_lea.sflag [#allocation7], %s1911_s13 }
 0x335   : > { %s1812_s10 = scalar_lea.hbm %s1884_s4, %s1076_s23  ;;  %s1380_s8 = scalar_lea.vmem %s1807_s20, 512 }
 0x336   : > { %p1381_p10 = scmp.ne.s32.totalorder %s1807_s20, %s1380_s8  ;;  %s1513_s21 = smov [#allocation6]  }
 0x337   : > { %s1384_s22 = sshll.u32 %s1513_s21, 4  ;;  %s1385_s22 = int_to_ptr.vmem [resolvable:$false] %s1384_s22 }
 0x338   : > { %p1382_p13 = pnand %p1381_p10, %p1641_p11  ;;  %s1386_s27 = scalar_lea.vmem %s1385_s22, 1024 }
 0x339   : > { %p1387_p2 = scmp.lt.s32.totalorder %s1807_s20, %s1385_s22  ;;  %p1388_p1 = scmp.lt.s32.totalorder %s1386_s27, %s1380_s8 }
 0x33a   : > { %p1383_p0 = pneg %p1382_p13 }
 0x33b   : > { %p1389_p3 = por %p1388_p1, %p1387_p2 }
 0x33d   : > { %p1390_p4 = pnand %p1389_p3, %p1383_p0 }
 0x33f   : > { %1393 = shalt.err (!%p1390_p4)
}
 0x340   : > { %s1394_s12 = scalar_lea.hbm %s1812_s10, 512  ;;  %s1398_s7 = scalar_lea.hbm %s1884_s4, 2048 }
 0x341   : > { %p1395_p5 = scmp.ne.s32.totalorder %s1812_s10, %s1394_s12  ;;  %p1399_p8 = scmp.lt.u32.totalorder %s1812_s10, %s1884_s4 }
 0x342   : > { %p1400_p9 = scmp.lt.u32.totalorder %s1398_s7, %s1394_s12  ;;  %p1402_p13 = scmp.lt.u32.totalorder %s1394_s12, %s1812_s10 }
 0x343   : > { %p1396_p6 = pnand %p1395_p5, %p1641_p11 }
 0x344   : > { %p1401_p10 = por %p1400_p9, %p1399_p8 }
 0x345   : > { %p1397_p7 = pneg %p1396_p6 }
 0x346   : > { %p1403_p0 = por %p1402_p13, %p1401_p10 }
 0x348   : > { %p1404_p2 = pnand %p1403_p0, %p1397_p7 }
 0x34a   : > { %1407 = shalt.err (!%p1404_p2)
}
 0x34b   : > { %s1514_s29 = smov 128   ;;  %s1515_s16 = smov 256  }
 0x34c   : > { %s1516_s6 = smov 8  }
 0x34d   : > { %1233 = dma.vmem_to_hbm [thread:$0]  (%p1641_p11), %s1807_s20, 512, %s1812_s10, %s1816_s5, %s1514_s29, %s1515_s16, %s1516_s6  }
 0x34e PF: > { %s1912_s0 = sld [smem:[#allocation9_spill]]  ;;  %p1239_p1 = scmp.ge.s32.totalorder %s1506_s26, 2 }
 0x350   : > { %p1236_p3 = pnand %p1239_p1, %p1645_p12 }
 0x354   : > { %s910_s23 = sand.u32 1, %s1912_s0  }
 0x355   : > { %s911_s24 = scalar_lea.sflag [#allocation7], %s910_s23 }
 0x356   : > { %1457 = dma.done.wait (!%p1236_p3), %s911_s24, 512  }
 0x357   : > { %1459 = vsyncadd (!%p1236_p3), %s911_s24, 4294966784  ;;  %s17_s26 = sadd.s32 1, %s1506_s26   ;;  %s1914_s11 = sld [smem:[#allocation17_spill]] }
 0x358   : > { %p14_p4 = scmp.ge.s32.totalorder %s17_s26, 10   ;;  %s1915_s20 = sld [smem:[#allocation10_spill]] }
 0x359   : > { %s1916_s21 = sld [smem:[#allocation11_spill]]  ;;  %s1917_s22 = sld [smem:[#allocation12_spill]] }
 0x35a   : > { %s1918_s23 = sld [smem:[#allocation13_spill]]  ;;  %s1919_s24 = sld [smem:[#allocation14_spill]] }
 0x35b   : > { %s1920_s25 = sld [smem:[#allocation15_spill]]  ;;  %s1921_s15 = smov %s1474_s18 }
 0x35c   : > { %s1922_s16 = smov %s1470_s17  ;;  %s1923_s17 = smov %s1656_s28 }
 0x35d   : > { %s1924_s18 = smov %s1478_s19  ;;  %s1925_s19 = smov %s1914_s11 }
 0x35e   :  { %16 = sbr.rel (!%p14_p4) target bundleno = 10 (0xa), region = 174 }
 0x365   :  { %916 = vsyncpa [#allocation7], 1 }
 0x366   :  { %918 = vsyncpa [#allocation7 + $0x1], 1 }

</bundles_post_ra>
